<compile_context>
chip_gen: v7x
topology: tpu7x:2x2x1
jax: 0.10.0
libtpu: 0.0.40
codegen_flags: <defaults>
</compile_context>

<pallas_src>
import functools

import jax
import jax.numpy as jnp
from jax import lax
from jax.experimental import pallas as pl
from jax.experimental.pallas import tpu as pltpu


# ConvTranspose2d(k=4,s=2,p=1): output parity p receives contributions only from
# input offsets d below, through kernel tap _TAP_OF[p][d]  (same table for rows/cols).
_TAP_OF = ({0: 1, -1: 3}, {0: 2, 1: 0})


# ----------------------------------------------------------------------------
# Fused kernel: features[0] + features[1] + deconv, one grid step per batch.
# Layout: (C, s) with s = m*Wp + n on lanes; the padded scratch is indexed by
# t = i*Wp + j over the (Hp, Wp) haloed grid, so a spatial tap (dh, dw) is the
# contiguous slice pad_ref[:, s0 + dh*Wp + dw : ... + N].
# ----------------------------------------------------------------------------
def _fused_kernel(cols_ref, mask_ref, w1_ref, b1_ref, wdw_ref, b2_ref,
                  wpw_ref, b3_ref, wdec_ref, bdec_ref, o_ref, pad_ref, *, Wp):
    C, LP = pad_ref.shape
    N = cols_ref.shape[-1]               # Ho * Wp (flat spatial, width padded by 2)
    head = Wp + 1                        # flat offset of padded position (1, 1)
    mask = mask_ref[...]                 # (1, N): 1 on real columns, 0 on the 2 pads

    # ---- features[0]: 3x3/s2 conv as one channel-major dot + folded BN + Hardswish
    y = jnp.dot(w1_ref[...], cols_ref[...],
                preferred_element_type=jnp.float32) + b1_ref[...]       # (C, N)
    y = y * jnp.clip(y + 3.0, 0.0, 6.0) * (1.0 / 6.0)

    # Realize the 1-pixel zero halo: two tiny strip zero-stores + ONE contiguous
    # lane-dense interior store (the column mask supplies the left/right halo
    # zeros that fall inside the contiguous range).  Strips are re-zeroed every
    # step so the kernel stays correct if the batch axis is split across cores.
    pad_ref[:, 0:head] = jnp.zeros((C, head), jnp.float32)
    pad_ref[:, head + N:LP] = jnp.zeros((C, LP - head - N), jnp.float32)
    pad_ref[:, head:head + N] = y * mask

    # ---- features[1]: depthwise 3x3 = 9 shifted, contiguous lane-dense MACs
    acc = jnp.zeros((C, N), jnp.float32)
    for kh in range(3):
        for kw in range(3):
            acc = acc + wdw_ref[kh * 3 + kw] * pad_ref[:, pl.ds(kh * Wp + kw, N)]
    t = jnp.maximum(acc + b2_ref[...], 0.0)                              # BN + ReLU

    # pointwise 1x1 (+ folded BN) and residual (shifted interior view of scratch)
    z = jnp.dot(wpw_ref[...], t, preferred_element_type=jnp.float32) + b3_ref[...]
    u = z + pad_ref[:, pl.ds(head, N)]

    # reuse the same padded scratch for the deconv input: the interior is fully
    # overwritten before any deconv tap read and the halo strips are already zero.
    pad_ref[:, head:head + N] = u * mask

    # ---- ConvTranspose2d(16,3,k=4,s=2,p=1): 9 shifted taps x (4*Cout, C) weights
    # accumulated on the MXU (no dcols buffer).  Output rows ordered (po, qo, co),
    # columns share the flat spatial index -> one unmasked lane-dense store.
    res = jnp.zeros((o_ref.shape[0], N), jnp.float32)
    for dh in range(3):
        for dv in range(3):
            res = res + jnp.dot(wdec_ref[dh * 3 + dv],
                                pad_ref[:, pl.ds(dh * Wp + dv, N)],
                                preferred_element_type=jnp.float32)
    o_ref[...] = (res + bdec_ref[...]).astype(o_ref.dtype)


# ----------------------------------------------------------------------------
# Weight / input prep (tiny, weight-sized ops; done inside the jitted wrapper)
# ----------------------------------------------------------------------------
def _pack_deconv_taps(w_dec):
    """(4,4,Cin,Cout) -> (9, 4*Cout, Cin) channel-major per-(dh,dv) tap weights.

    Row order is (po, qo, co); rows where a tap does not contribute to a parity
    are zero.  Bias rows must be tiled in the same (po, qo, co) order."""
    Cin, Cout = w_dec.shape[2], w_dec.shape[3]
    zero = jnp.zeros((Cout, Cin), w_dec.dtype)
    taps = []
    for dh in (-1, 0, 1):
        for dv in (-1, 0, 1):
            rows = []
            for po in (0, 1):
                for qo in (0, 1):
                    if dh in _TAP_OF[po] and dv in _TAP_OF[qo]:
                        rows.append(w_dec[_TAP_OF[po][dh], _TAP_OF[qo][dv]].T)
                    else:
                        rows.append(zero)
            taps.append(jnp.concatenate(rows, axis=0))          # (4*Cout, Cin)
    return jnp.stack(taps, axis=0)                              # (9, 4*Cout, Cin)


def _im2col_s2_cm(x):
    """NCHW x -> (B, 9*Cin, Ho*Wp) channel-major patches for the 3x3/s2/p1 conv.

    Columns use the flat padded-width index s = m*Wp + n (Wp = Wo+2); the two
    extra columns per row are zero (they are masked again in-kernel)."""
    B, Cin, H, W = x.shape
    Ho, Wo = H // 2, W // 2
    xp = jnp.pad(x, ((0, 0), (0, 0), (1, 1), (1, 1)))
    slabs = [xp[:, :, kh:kh + 2 * Ho:2, kw:kw + 2 * Wo:2]
             for kh in range(3) for kw in range(3)]             # each (B,Cin,Ho,Wo)
    cols = jnp.stack(slabs, axis=1)                             # (B,9,Cin,Ho,Wo)
    cols = jnp.pad(cols, ((0, 0),) * 4 + ((0, 2),))             # Wo -> Wp
    return cols.reshape(B, 9 * Cin, Ho * (Wo + 2))


# ----------------------------------------------------------------------------
# Full forward
# ----------------------------------------------------------------------------
@jax.jit
def mobilenet_forward(x_nchw, p):
    B, Cin, H, W = x_nchw.shape
    Ho, Wo = H // 2, W // 2
    Hp, Wp = Ho + 2, Wo + 2
    N = Ho * Wp                                   # flat spatial extent per image
    LP = Hp * Wp + Wp                             # padded scratch length (+ slack)
    C = p['w_dw'].shape[-1]
    Cout = p['w_dec'].shape[-1]

    # fold BN scales into conv weights (exact); shifts become per-channel biases
    w1 = (p['w1'] * p['bn1_scale']).reshape(9 * Cin, C).T       # (C, 27)
    b1 = p['bn1_shift'].reshape(C, 1)
    wdw = (p['w_dw'] * p['bn2_scale']).reshape(9, C, 1)         # (9, C, 1)
    b2 = p['bn2_shift'].reshape(C, 1)
    wpw = (p['w_pw'] * p['bn3_scale']).T                        # (Cout_pw=C, C)
    b3 = p['bn3_shift'].reshape(C, 1)
    wdec = _pack_deconv_taps(p['w_dec'])                        # (9, 4*Cout, C)
    bdec = jnp.tile(p['b_dec'], 4).reshape(4 * Cout, 1)         # rows = (po,qo,co)

    cols = _im2col_s2_cm(x_nchw)                                # (B, 27, N)
    mask = (jnp.arange(N, dtype=jnp.int32) % Wp < Wo)
    mask = mask.astype(jnp.float32).reshape(1, N)

    kernel = functools.partial(_fused_kernel, Wp=Wp)
    out = pl.pallas_call(
        kernel,
        out_shape=jax.ShapeDtypeStruct((B, 4 * Cout, N), jnp.float32),
        grid=(B,),
        in_specs=[
            pl.BlockSpec((None, 9 * Cin, N), lambda b: (b, 0, 0)),   # cols
            pl.BlockSpec((1, N), lambda b: (0, 0)),                  # column mask
            pl.BlockSpec((C, 9 * Cin), lambda b: (0, 0)),            # w1 (folded)
            pl.BlockSpec((C, 1), lambda b: (0, 0)),                  # b1
            pl.BlockSpec((9, C, 1), lambda b: (0, 0, 0)),            # depthwise w
            pl.BlockSpec((C, 1), lambda b: (0, 0)),                  # b2
            pl.BlockSpec((C, C), lambda b: (0, 0)),                  # pointwise w
            pl.BlockSpec((C, 1), lambda b: (0, 0)),                  # b3
            pl.BlockSpec((9, 4 * Cout, C), lambda b: (0, 0, 0)),     # deconv taps
            pl.BlockSpec((4 * Cout, 1), lambda b: (0, 0)),           # deconv bias
        ],
        out_specs=pl.BlockSpec((None, 4 * Cout, N), lambda b: (b, 0, 0)),
        scratch_shapes=[
            pltpu.VMEM((C, LP), jnp.float32),     # shared haloed activation buffer
        ],
        compiler_params=pltpu.CompilerParams(
            dimension_semantics=("parallel",)),   # both TensorCores on v7x
    )(cols, mask, w1, b1, wdw, b2, wpw, b3, wdec, bdec)

    # pixel-shuffle the parity-decomposed deconv output back to NCHW; this is the
    # only wrapper-side relayout and it touches the smallest tensor in the graph.
    o = out.reshape(B, 2, 2, Cout, Ho, Wp)[..., :Wo]            # drop pad columns
    o = o.transpose(0, 3, 4, 1, 5, 2)                           # (B,Cout,Ho,2,Wo,2)
    return o.reshape(B, Cout, 2 * Ho, 2 * Wo)


# ----------------------------------------------------------------------------
# Parameter init + pure-JAX reference
# ----------------------------------------------------------------------------
def init_params(seed=0):
    # TODO(synk): torchvision IMAGENET1K_V1 weights cannot be loaded in-script;
    # layer shapes match mobilenet_v3_large.features[:2], values are random.
    key = jax.random.PRNGKey(seed)
    keys = jax.random.split(key, 8)
    C, eps = 16, 1e-3

    def bn_fold(k, c):
        kg, kb, km, kv = jax.random.split(k, 4)
        gamma = 1.0 + 0.1 * jax.random.normal(kg, (c,), jnp.float32)
        beta = 0.1 * jax.random.normal(kb, (c,), jnp.float32)
        mean = 0.1 * jax.random.normal(km, (c,), jnp.float32)
        var = jax.random.uniform(kv, (c,), jnp.float32, minval=0.5, maxval=1.5)
        scale = gamma / jnp.sqrt(var + eps)
        return scale, beta - mean * scale

    # Conv2d(3,16,3,s=2,p=1) torch OIHW(16,3,3,3) stored here as HWIO (3,3,3,16)
    w1 = 0.2 * jax.random.normal(keys[0], (3, 3, 3, C), jnp.float32)
    bn1_scale, bn1_shift = bn_fold(keys[1], C)
    # depthwise Conv2d(16,16,3,groups=16): torch (16,1,3,3) stored as (3,3,16)
    w_dw = 0.2 * jax.random.normal(keys[2], (3, 3, C), jnp.float32)
    bn2_scale, bn2_shift = bn_fold(keys[3], C)
    # pointwise Conv2d(16,16,1): torch (16,16,1,1) stored as (Cin,Cout)
    w_pw = 0.2 * jax.random.normal(keys[4], (C, C), jnp.float32)
    bn3_scale, bn3_shift = bn_fold(keys[5], C)
    # ConvTranspose2d(16,3,4,s=2,p=1): torch (Cin=16,Cout=3,4,4) stored as (4,4,16,3)
    w_dec = 0.2 * jax.random.normal(keys[6], (4, 4, C, 3), jnp.float32)
    b_dec = 0.1 * jax.random.normal(keys[7], (3,), jnp.float32)
    return dict(w1=w1, bn1_scale=bn1_scale, bn1_shift=bn1_shift,
                w_dw=w_dw, bn2_scale=bn2_scale, bn2_shift=bn2_shift,
                w_pw=w_pw, bn3_scale=bn3_scale, bn3_shift=bn3_shift,
                w_dec=w_dec, b_dec=b_dec)


def reference_forward(x_nchw, p):
    """Pure-JAX (lax.conv) reference of the same forward pass, NHWC internally."""
    x = jnp.transpose(x_nchw, (0, 2, 3, 1))
    dn = ('NHWC', 'HWIO', 'NHWC')
    hi = lax.Precision.HIGHEST
    y = lax.conv_general_dilated(x, p['w1'], (2, 2), [(1, 1), (1, 1)],
                                 dimension_numbers=dn, precision=hi)
    y = y * p['bn1_scale'] + p['bn1_shift']
    y = y * jnp.clip(y + 3.0, 0.0, 6.0) / 6.0
    C = p['w_dw'].shape[-1]
    z = lax.conv_general_dilated(y, p['w_dw'][:, :, None, :], (1, 1),
                                 [(1, 1), (1, 1)], dimension_numbers=dn,
                                 feature_group_count=C, precision=hi)
    z = jnp.maximum(z * p['bn2_scale'] + p['bn2_shift'], 0.0)
    u = lax.conv_general_dilated(z, p['w_pw'][None, None, :, :], (1, 1),
                                 [(0, 0), (0, 0)], dimension_numbers=dn, precision=hi)
    u = u * p['bn3_scale'] + p['bn3_shift'] + y
    # transposed conv == lhs-dilated conv with spatially flipped kernel
    o = lax.conv_general_dilated(u, p['w_dec'][::-1, ::-1, :, :], (1, 1),
                                 [(2, 2), (2, 2)], lhs_dilation=(2, 2),
                                 dimension_numbers=dn, precision=hi)
    o = o + p['b_dec']
    return jnp.transpose(o, (0, 3, 1, 2))


if __name__ == "__main__":
    params = init_params(seed=0)
    x = jax.random.normal(jax.random.PRNGKey(0), (2, 3, 16, 16), jnp.float32)  # NCHW

    out = jax.block_until_ready(mobilenet_forward(x, params))
    ref = jax.block_until_ready(reference_forward(x, params))

    assert out.shape == (2, 3, 16, 16), out.shape
    err = float(jnp.max(jnp.abs(out - ref)))
    assert jnp.allclose(out, ref, atol=1e-3, rtol=1e-3), err
    print("KERNEL_OK")
</pallas_src>

<mosaic_0001>
module attributes {stable_mosaic.version = 11 : i64} {
  func.func @_fused_kernel(%arg0: i32, %arg1: memref<1x27x80xf32, #tpu.memory_space<vmem>>, %arg2: memref<1x80xf32, #tpu.memory_space<vmem>>, %arg3: memref<16x27xf32, #tpu.memory_space<vmem>>, %arg4: memref<16x1xf32, #tpu.memory_space<vmem>>, %arg5: memref<9x16x1xf32, #tpu.memory_space<vmem>>, %arg6: memref<16x1xf32, #tpu.memory_space<vmem>>, %arg7: memref<16x16xf32, #tpu.memory_space<vmem>>, %arg8: memref<16x1xf32, #tpu.memory_space<vmem>>, %arg9: memref<9x12x16xf32, #tpu.memory_space<vmem>>, %arg10: memref<12x1xf32, #tpu.memory_space<vmem>>, %arg11: memref<1x12x80xf32, #tpu.memory_space<vmem>>, %arg12: memref<16x110xf32, #tpu.memory_space<vmem>>) attributes {dimension_semantics = [#tpu.dimension_semantics<parallel>], iteration_bounds = array<i64: 2>, scalar_prefetch = 0 : i64, scratch_operands = 1 : i64, tpu.core_type = #tpu.core_type<tc>, window_params = [{transform_indices = @transform_0, window_bounds = array<i64: 1, 27, 80>}, {pipeline_mode = #tpu.pipeline_mode<synchronous>, transform_indices = @transform_1, window_bounds = array<i64: 1, 80>}, {pipeline_mode = #tpu.pipeline_mode<synchronous>, transform_indices = @transform_2, window_bounds = array<i64: 16, 27>}, {pipeline_mode = #tpu.pipeline_mode<synchronous>, transform_indices = @transform_3, window_bounds = array<i64: 16, 1>}, {pipeline_mode = #tpu.pipeline_mode<synchronous>, transform_indices = @transform_4, window_bounds = array<i64: 9, 16, 1>}, {pipeline_mode = #tpu.pipeline_mode<synchronous>, transform_indices = @transform_5, window_bounds = array<i64: 16, 1>}, {pipeline_mode = #tpu.pipeline_mode<synchronous>, transform_indices = @transform_6, window_bounds = array<i64: 16, 16>}, {pipeline_mode = #tpu.pipeline_mode<synchronous>, transform_indices = @transform_7, window_bounds = array<i64: 16, 1>}, {pipeline_mode = #tpu.pipeline_mode<synchronous>, transform_indices = @transform_8, window_bounds = array<i64: 9, 12, 16>}, {pipeline_mode = #tpu.pipeline_mode<synchronous>, transform_indices = @transform_9, window_bounds = array<i64: 12, 1>}, {transform_indices = @transform_10, window_bounds = array<i64: 1, 12, 80>}]} {
    %c0 = arith.constant 0 : index
    %c0_0 = arith.constant 0 : index
    %0 = vector.load %arg2[%c0, %c0_0] : memref<1x80xf32, #tpu.memory_space<vmem>>, vector<1x80xf32>
    %c0_1 = arith.constant 0 : index
    %c0_2 = arith.constant 0 : index
    %1 = vector.load %arg3[%c0_1, %c0_2] : memref<16x27xf32, #tpu.memory_space<vmem>>, vector<16x27xf32>
    %c0_3 = arith.constant 0 : index
    %c0_4 = arith.constant 0 : index
    %c0_5 = arith.constant 0 : index
    %2 = vector.load %arg1[%c0_3, %c0_4, %c0_5] : memref<1x27x80xf32, #tpu.memory_space<vmem>>, vector<1x27x80xf32>
    %3 = vector.shape_cast %2 : vector<1x27x80xf32> to vector<27x80xf32>
    %cst = arith.constant dense<0.000000e+00> : vector<16x80xf32>
    %4 = tpu.matmul %1, %3, %cst {dimension_numbers = #tpu.dot_dimension_numbers<[1], [0], [0], [1], [0, 0, 1, 1], [], []>} : vector<16x27xf32>, vector<27x80xf32>, vector<16x80xf32> -> vector<16x80xf32>
    %c0_6 = arith.constant 0 : index
    %c0_7 = arith.constant 0 : index
    %5 = vector.load %arg4[%c0_6, %c0_7] : memref<16x1xf32, #tpu.memory_space<vmem>>, vector<16x1xf32>
    %6 = vector.broadcast %5 : vector<16x1xf32> to vector<16x80xf32>
    %7 = arith.addf %4, %6 : vector<16x80xf32>
    %cst_8 = arith.constant 3.000000e+00 : f32
    %8 = vector.broadcast %cst_8 : f32 to vector<16x80xf32>
    %9 = arith.addf %7, %8 : vector<16x80xf32>
    %cst_9 = arith.constant 0.000000e+00 : f32
    %cst_10 = arith.constant 6.000000e+00 : f32
    %10 = vector.broadcast %cst_9 : f32 to vector<16x80xf32>
    %11 = arith.maximumf %10, %9 : vector<16x80xf32>
    %12 = vector.broadcast %cst_10 : f32 to vector<16x80xf32>
    %13 = arith.minimumf %12, %11 : vector<16x80xf32>
    %14 = arith.mulf %7, %13 : vector<16x80xf32>
    %cst_11 = arith.constant 0.166666672 : f32
    %15 = vector.broadcast %cst_11 : f32 to vector<16x80xf32>
    %16 = arith.mulf %14, %15 : vector<16x80xf32>
    %cst_12 = arith.constant 0.000000e+00 : f32
    %17 = vector.broadcast %cst_12 : f32 to vector<16x11xf32>
    %c0_13 = arith.constant 0 : index
    %c0_14 = arith.constant 0 : index
    %18 = vector.load %arg12[%c0_13, %c0_14] : memref<16x110xf32, #tpu.memory_space<vmem>>, vector<16x11xf32>
    tpu.vector_store %arg12[%c0_13, %c0_14], %17 {strides = array<i32>} : memref<16x110xf32, #tpu.memory_space<vmem>>, vector<16x11xf32>,
    %cst_15 = arith.constant 0.000000e+00 : f32
    %19 = vector.broadcast %cst_15 : f32 to vector<16x19xf32>
    %c0_16 = arith.constant 0 : index
    %c91 = arith.constant 91 : index
    %20 = vector.load %arg12[%c0_16, %c91] : memref<16x110xf32, #tpu.memory_space<vmem>>, vector<16x19xf32>
    tpu.vector_store %arg12[%c0_16, %c91], %19 {strides = array<i32>} : memref<16x110xf32, #tpu.memory_space<vmem>>, vector<16x19xf32>,
    %21 = vector.broadcast %0 : vector<1x80xf32> to vector<16x80xf32>
    %22 = arith.mulf %16, %21 : vector<16x80xf32>
    %c0_17 = arith.constant 0 : index
    %c11 = arith.constant 11 : index
    %23 = vector.load %arg12[%c0_17, %c11] : memref<16x110xf32, #tpu.memory_space<vmem>>, vector<16x80xf32>
    tpu.vector_store %arg12[%c0_17, %c11], %22 {strides = array<i32>} : memref<16x110xf32, #tpu.memory_space<vmem>>, vector<16x80xf32>,
    %cst_18 = arith.constant 0.000000e+00 : f32
    %24 = vector.broadcast %cst_18 : f32 to vector<16x80xf32>
    %c0_19 = arith.constant 0 : index
    %c0_20 = arith.constant 0 : index
    %c0_21 = arith.constant 0 : index
    %25 = vector.load %arg5[%c0_19, %c0_20, %c0_21] : memref<9x16x1xf32, #tpu.memory_space<vmem>>, vector<1x16x1xf32>
    %26 = vector.shape_cast %25 : vector<1x16x1xf32> to vector<16x1xf32>
    %c0_22 = arith.constant 0 : index
    %c0_23 = arith.constant 0 : index
    %27 = vector.load %arg12[%c0_22, %c0_23] : memref<16x110xf32, #tpu.memory_space<vmem>>, vector<16x80xf32>
    %28 = vector.broadcast %26 : vector<16x1xf32> to vector<16x80xf32>
    %29 = arith.mulf %28, %27 : vector<16x80xf32>
    %30 = arith.addf %24, %29 : vector<16x80xf32>
    %c1 = arith.constant 1 : index
    %c0_24 = arith.constant 0 : index
    %c0_25 = arith.constant 0 : index
    %31 = vector.load %arg5[%c1, %c0_24, %c0_25] : memref<9x16x1xf32, #tpu.memory_space<vmem>>, vector<1x16x1xf32>
    %32 = vector.shape_cast %31 : vector<1x16x1xf32> to vector<16x1xf32>
    %c0_26 = arith.constant 0 : index
    %c1_27 = arith.constant 1 : index
    %33 = vector.load %arg12[%c0_26, %c1_27] : memref<16x110xf32, #tpu.memory_space<vmem>>, vector<16x80xf32>
    %34 = vector.broadcast %32 : vector<16x1xf32> to vector<16x80xf32>
    %35 = arith.mulf %34, %33 : vector<16x80xf32>
    %36 = arith.addf %30, %35 : vector<16x80xf32>
    %c2 = arith.constant 2 : index
    %c0_28 = arith.constant 0 : index
    %c0_29 = arith.constant 0 : index
    %37 = vector.load %arg5[%c2, %c0_28, %c0_29] : memref<9x16x1xf32, #tpu.memory_space<vmem>>, vector<1x16x1xf32>
    %38 = vector.shape_cast %37 : vector<1x16x1xf32> to vector<16x1xf32>
    %c0_30 = arith.constant 0 : index
    %c2_31 = arith.constant 2 : index
    %39 = vector.load %arg12[%c0_30, %c2_31] : memref<16x110xf32, #tpu.memory_space<vmem>>, vector<16x80xf32>
    %40 = vector.broadcast %38 : vector<16x1xf32> to vector<16x80xf32>
    %41 = arith.mulf %40, %39 : vector<16x80xf32>
    %42 = arith.addf %36, %41 : vector<16x80xf32>
    %c3 = arith.constant 3 : index
    %c0_32 = arith.constant 0 : index
    %c0_33 = arith.constant 0 : index
    %43 = vector.load %arg5[%c3, %c0_32, %c0_33] : memref<9x16x1xf32, #tpu.memory_space<vmem>>, vector<1x16x1xf32>
    %44 = vector.shape_cast %43 : vector<1x16x1xf32> to vector<16x1xf32>
    %c0_34 = arith.constant 0 : index
    %c10 = arith.constant 10 : index
    %45 = vector.load %arg12[%c0_34, %c10] : memref<16x110xf32, #tpu.memory_space<vmem>>, vector<16x80xf32>
    %46 = vector.broadcast %44 : vector<16x1xf32> to vector<16x80xf32>
    %47 = arith.mulf %46, %45 : vector<16x80xf32>
    %48 = arith.addf %42, %47 : vector<16x80xf32>
    %c4 = arith.constant 4 : index
    %c0_35 = arith.constant 0 : index
    %c0_36 = arith.constant 0 : index
    %49 = vector.load %arg5[%c4, %c0_35, %c0_36] : memref<9x16x1xf32, #tpu.memory_space<vmem>>, vector<1x16x1xf32>
    %50 = vector.shape_cast %49 : vector<1x16x1xf32> to vector<16x1xf32>
    %c0_37 = arith.constant 0 : index
    %c11_38 = arith.constant 11 : index
    %51 = vector.load %arg12[%c0_37, %c11_38] : memref<16x110xf32, #tpu.memory_space<vmem>>, vector<16x80xf32>
    %52 = vector.broadcast %50 : vector<16x1xf32> to vector<16x80xf32>
    %53 = arith.mulf %52, %51 : vector<16x80xf32>
    %54 = arith.addf %48, %53 : vector<16x80xf32>
    %c5 = arith.constant 5 : index
    %c0_39 = arith.constant 0 : index
    %c0_40 = arith.constant 0 : index
    %55 = vector.load %arg5[%c5, %c0_39, %c0_40] : memref<9x16x1xf32, #tpu.memory_space<vmem>>, vector<1x16x1xf32>
    %56 = vector.shape_cast %55 : vector<1x16x1xf32> to vector<16x1xf32>
    %c0_41 = arith.constant 0 : index
    %c12 = arith.constant 12 : index
    %57 = vector.load %arg12[%c0_41, %c12] : memref<16x110xf32, #tpu.memory_space<vmem>>, vector<16x80xf32>
    %58 = vector.broadcast %56 : vector<16x1xf32> to vector<16x80xf32>
    %59 = arith.mulf %58, %57 : vector<16x80xf32>
    %60 = arith.addf %54, %59 : vector<16x80xf32>
    %c6 = arith.constant 6 : index
    %c0_42 = arith.constant 0 : index
    %c0_43 = arith.constant 0 : index
    %61 = vector.load %arg5[%c6, %c0_42, %c0_43] : memref<9x16x1xf32, #tpu.memory_space<vmem>>, vector<1x16x1xf32>
    %62 = vector.shape_cast %61 : vector<1x16x1xf32> to vector<16x1xf32>
    %c0_44 = arith.constant 0 : index
    %c20 = arith.constant 20 : index
    %63 = vector.load %arg12[%c0_44, %c20] : memref<16x110xf32, #tpu.memory_space<vmem>>, vector<16x80xf32>
    %64 = vector.broadcast %62 : vector<16x1xf32> to vector<16x80xf32>
    %65 = arith.mulf %64, %63 : vector<16x80xf32>
    %66 = arith.addf %60, %65 : vector<16x80xf32>
    %c7 = arith.constant 7 : index
    %c0_45 = arith.constant 0 : index
    %c0_46 = arith.constant 0 : index
    %67 = vector.load %arg5[%c7, %c0_45, %c0_46] : memref<9x16x1xf32, #tpu.memory_space<vmem>>, vector<1x16x1xf32>
    %68 = vector.shape_cast %67 : vector<1x16x1xf32> to vector<16x1xf32>
    %c0_47 = arith.constant 0 : index
    %c21 = arith.constant 21 : index
    %69 = vector.load %arg12[%c0_47, %c21] : memref<16x110xf32, #tpu.memory_space<vmem>>, vector<16x80xf32>
    %70 = vector.broadcast %68 : vector<16x1xf32> to vector<16x80xf32>
    %71 = arith.mulf %70, %69 : vector<16x80xf32>
    %72 = arith.addf %66, %71 : vector<16x80xf32>
    %c8 = arith.constant 8 : index
    %c0_48 = arith.constant 0 : index
    %c0_49 = arith.constant 0 : index
    %73 = vector.load %arg5[%c8, %c0_48, %c0_49] : memref<9x16x1xf32, #tpu.memory_space<vmem>>, vector<1x16x1xf32>
    %74 = vector.shape_cast %73 : vector<1x16x1xf32> to vector<16x1xf32>
    %c0_50 = arith.constant 0 : index
    %c22 = arith.constant 22 : index
    %75 = vector.load %arg12[%c0_50, %c22] : memref<16x110xf32, #tpu.memory_space<vmem>>, vector<16x80xf32>
    %76 = vector.broadcast %74 : vector<16x1xf32> to vector<16x80xf32>
    %77 = arith.mulf %76, %75 : vector<16x80xf32>
    %78 = arith.addf %72, %77 : vector<16x80xf32>
    %c0_51 = arith.constant 0 : index
    %c0_52 = arith.constant 0 : index
    %79 = vector.load %arg6[%c0_51, %c0_52] : memref<16x1xf32, #tpu.memory_space<vmem>>, vector<16x1xf32>
    %80 = vector.broadcast %79 : vector<16x1xf32> to vector<16x80xf32>
    %81 = arith.addf %78, %80 : vector<16x80xf32>
    %cst_53 = arith.constant 0.000000e+00 : f32
    %82 = vector.broadcast %cst_53 : f32 to vector<16x80xf32>
    %83 = arith.maximumf %81, %82 : vector<16x80xf32>
    %c0_54 = arith.constant 0 : index
    %c0_55 = arith.constant 0 : index
    %84 = vector.load %arg7[%c0_54, %c0_55] : memref<16x16xf32, #tpu.memory_space<vmem>>, vector<16x16xf32>
    %cst_56 = arith.constant dense<0.000000e+00> : vector<16x80xf32>
    %85 = tpu.matmul %84, %83, %cst_56 {dimension_numbers = #tpu.dot_dimension_numbers<[1], [0], [0], [1], [0, 0, 1, 1], [], []>} : vector<16x16xf32>, vector<16x80xf32>, vector<16x80xf32> -> vector<16x80xf32>
    %c0_57 = arith.constant 0 : index
    %c0_58 = arith.constant 0 : index
    %86 = vector.load %arg8[%c0_57, %c0_58] : memref<16x1xf32, #tpu.memory_space<vmem>>, vector<16x1xf32>
    %87 = vector.broadcast %86 : vector<16x1xf32> to vector<16x80xf32>
    %88 = arith.addf %85, %87 : vector<16x80xf32>
    %c0_59 = arith.constant 0 : index
    %c11_60 = arith.constant 11 : index
    %89 = vector.load %arg12[%c0_59, %c11_60] : memref<16x110xf32, #tpu.memory_space<vmem>>, vector<16x80xf32>
    %90 = arith.addf %88, %89 : vector<16x80xf32>
    %91 = vector.broadcast %0 : vector<1x80xf32> to vector<16x80xf32>
    %92 = arith.mulf %90, %91 : vector<16x80xf32>
    %c0_61 = arith.constant 0 : index
    %c11_62 = arith.constant 11 : index
    %93 = vector.load %arg12[%c0_61, %c11_62] : memref<16x110xf32, #tpu.memory_space<vmem>>, vector<16x80xf32>
    tpu.vector_store %arg12[%c0_61, %c11_62], %92 {strides = array<i32>} : memref<16x110xf32, #tpu.memory_space<vmem>>, vector<16x80xf32>,
    %cst_63 = arith.constant 0.000000e+00 : f32
    %94 = vector.broadcast %cst_63 : f32 to vector<12x80xf32>
    %c0_64 = arith.constant 0 : index
    %c0_65 = arith.constant 0 : index
    %c0_66 = arith.constant 0 : index
    %95 = vector.load %arg9[%c0_64, %c0_65, %c0_66] : memref<9x12x16xf32, #tpu.memory_space<vmem>>, vector<1x12x16xf32>
    %96 = vector.shape_cast %95 : vector<1x12x16xf32> to vector<12x16xf32>
    %c0_67 = arith.constant 0 : index
    %c0_68 = arith.constant 0 : index
    %97 = vector.load %arg12[%c0_67, %c0_68] : memref<16x110xf32, #tpu.memory_space<vmem>>, vector<16x80xf32>
    %cst_69 = arith.constant dense<0.000000e+00> : vector<12x80xf32>
    %98 = tpu.matmul %96, %97, %cst_69 {dimension_numbers = #tpu.dot_dimension_numbers<[1], [0], [0], [1], [0, 0, 1, 1], [], []>} : vector<12x16xf32>, vector<16x80xf32>, vector<12x80xf32> -> vector<12x80xf32>
    %99 = arith.addf %94, %98 : vector<12x80xf32>
    %c1_70 = arith.constant 1 : index
    %c0_71 = arith.constant 0 : index
    %c0_72 = arith.constant 0 : index
    %100 = vector.load %arg9[%c1_70, %c0_71, %c0_72] : memref<9x12x16xf32, #tpu.memory_space<vmem>>, vector<1x12x16xf32>
    %101 = vector.shape_cast %100 : vector<1x12x16xf32> to vector<12x16xf32>
    %c0_73 = arith.constant 0 : index
    %c1_74 = arith.constant 1 : index
    %102 = vector.load %arg12[%c0_73, %c1_74] : memref<16x110xf32, #tpu.memory_space<vmem>>, vector<16x80xf32>
    %cst_75 = arith.constant dense<0.000000e+00> : vector<12x80xf32>
    %103 = tpu.matmul %101, %102, %cst_75 {dimension_numbers = #tpu.dot_dimension_numbers<[1], [0], [0], [1], [0, 0, 1, 1], [], []>} : vector<12x16xf32>, vector<16x80xf32>, vector<12x80xf32> -> vector<12x80xf32>
    %104 = arith.addf %99, %103 : vector<12x80xf32>
    %c2_76 = arith.constant 2 : index
    %c0_77 = arith.constant 0 : index
    %c0_78 = arith.constant 0 : index
    %105 = vector.load %arg9[%c2_76, %c0_77, %c0_78] : memref<9x12x16xf32, #tpu.memory_space<vmem>>, vector<1x12x16xf32>
    %106 = vector.shape_cast %105 : vector<1x12x16xf32> to vector<12x16xf32>
    %c0_79 = arith.constant 0 : index
    %c2_80 = arith.constant 2 : index
    %107 = vector.load %arg12[%c0_79, %c2_80] : memref<16x110xf32, #tpu.memory_space<vmem>>, vector<16x80xf32>
    %cst_81 = arith.constant dense<0.000000e+00> : vector<12x80xf32>
    %108 = tpu.matmul %106, %107, %cst_81 {dimension_numbers = #tpu.dot_dimension_numbers<[1], [0], [0], [1], [0, 0, 1, 1], [], []>} : vector<12x16xf32>, vector<16x80xf32>, vector<12x80xf32> -> vector<12x80xf32>
    %109 = arith.addf %104, %108 : vector<12x80xf32>
    %c3_82 = arith.constant 3 : index
    %c0_83 = arith.constant 0 : index
    %c0_84 = arith.constant 0 : index
    %110 = vector.load %arg9[%c3_82, %c0_83, %c0_84] : memref<9x12x16xf32, #tpu.memory_space<vmem>>, vector<1x12x16xf32>
    %111 = vector.shape_cast %110 : vector<1x12x16xf32> to vector<12x16xf32>
    %c0_85 = arith.constant 0 : index
    %c10_86 = arith.constant 10 : index
    %112 = vector.load %arg12[%c0_85, %c10_86] : memref<16x110xf32, #tpu.memory_space<vmem>>, vector<16x80xf32>
    %cst_87 = arith.constant dense<0.000000e+00> : vector<12x80xf32>
    %113 = tpu.matmul %111, %112, %cst_87 {dimension_numbers = #tpu.dot_dimension_numbers<[1], [0], [0], [1], [0, 0, 1, 1], [], []>} : vector<12x16xf32>, vector<16x80xf32>, vector<12x80xf32> -> vector<12x80xf32>
    %114 = arith.addf %109, %113 : vector<12x80xf32>
    %c4_88 = arith.constant 4 : index
    %c0_89 = arith.constant 0 : index
    %c0_90 = arith.constant 0 : index
    %115 = vector.load %arg9[%c4_88, %c0_89, %c0_90] : memref<9x12x16xf32, #tpu.memory_space<vmem>>, vector<1x12x16xf32>
    %116 = vector.shape_cast %115 : vector<1x12x16xf32> to vector<12x16xf32>
    %c0_91 = arith.constant 0 : index
    %c11_92 = arith.constant 11 : index
    %117 = vector.load %arg12[%c0_91, %c11_92] : memref<16x110xf32, #tpu.memory_space<vmem>>, vector<16x80xf32>
    %cst_93 = arith.constant dense<0.000000e+00> : vector<12x80xf32>
    %118 = tpu.matmul %116, %117, %cst_93 {dimension_numbers = #tpu.dot_dimension_numbers<[1], [0], [0], [1], [0, 0, 1, 1], [], []>} : vector<12x16xf32>, vector<16x80xf32>, vector<12x80xf32> -> vector<12x80xf32>
    %119 = arith.addf %114, %118 : vector<12x80xf32>
    %c5_94 = arith.constant 5 : index
    %c0_95 = arith.constant 0 : index
    %c0_96 = arith.constant 0 : index
    %120 = vector.load %arg9[%c5_94, %c0_95, %c0_96] : memref<9x12x16xf32, #tpu.memory_space<vmem>>, vector<1x12x16xf32>
    %121 = vector.shape_cast %120 : vector<1x12x16xf32> to vector<12x16xf32>
    %c0_97 = arith.constant 0 : index
    %c12_98 = arith.constant 12 : index
    %122 = vector.load %arg12[%c0_97, %c12_98] : memref<16x110xf32, #tpu.memory_space<vmem>>, vector<16x80xf32>
    %cst_99 = arith.constant dense<0.000000e+00> : vector<12x80xf32>
    %123 = tpu.matmul %121, %122, %cst_99 {dimension_numbers = #tpu.dot_dimension_numbers<[1], [0], [0], [1], [0, 0, 1, 1], [], []>} : vector<12x16xf32>, vector<16x80xf32>, vector<12x80xf32> -> vector<12x80xf32>
    %124 = arith.addf %119, %123 : vector<12x80xf32>
    %c6_100 = arith.constant 6 : index
    %c0_101 = arith.constant 0 : index
    %c0_102 = arith.constant 0 : index
    %125 = vector.load %arg9[%c6_100, %c0_101, %c0_102] : memref<9x12x16xf32, #tpu.memory_space<vmem>>, vector<1x12x16xf32>
    %126 = vector.shape_cast %125 : vector<1x12x16xf32> to vector<12x16xf32>
    %c0_103 = arith.constant 0 : index
    %c20_104 = arith.constant 20 : index
    %127 = vector.load %arg12[%c0_103, %c20_104] : memref<16x110xf32, #tpu.memory_space<vmem>>, vector<16x80xf32>
    %cst_105 = arith.constant dense<0.000000e+00> : vector<12x80xf32>
    %128 = tpu.matmul %126, %127, %cst_105 {dimension_numbers = #tpu.dot_dimension_numbers<[1], [0], [0], [1], [0, 0, 1, 1], [], []>} : vector<12x16xf32>, vector<16x80xf32>, vector<12x80xf32> -> vector<12x80xf32>
    %129 = arith.addf %124, %128 : vector<12x80xf32>
    %c7_106 = arith.constant 7 : index
    %c0_107 = arith.constant 0 : index
    %c0_108 = arith.constant 0 : index
    %130 = vector.load %arg9[%c7_106, %c0_107, %c0_108] : memref<9x12x16xf32, #tpu.memory_space<vmem>>, vector<1x12x16xf32>
    %131 = vector.shape_cast %130 : vector<1x12x16xf32> to vector<12x16xf32>
    %c0_109 = arith.constant 0 : index
    %c21_110 = arith.constant 21 : index
    %132 = vector.load %arg12[%c0_109, %c21_110] : memref<16x110xf32, #tpu.memory_space<vmem>>, vector<16x80xf32>
    %cst_111 = arith.constant dense<0.000000e+00> : vector<12x80xf32>
    %133 = tpu.matmul %131, %132, %cst_111 {dimension_numbers = #tpu.dot_dimension_numbers<[1], [0], [0], [1], [0, 0, 1, 1], [], []>} : vector<12x16xf32>, vector<16x80xf32>, vector<12x80xf32> -> vector<12x80xf32>
    %134 = arith.addf %129, %133 : vector<12x80xf32>
    %c8_112 = arith.constant 8 : index
    %c0_113 = arith.constant 0 : index
    %c0_114 = arith.constant 0 : index
    %135 = vector.load %arg9[%c8_112, %c0_113, %c0_114] : memref<9x12x16xf32, #tpu.memory_space<vmem>>, vector<1x12x16xf32>
    %136 = vector.shape_cast %135 : vector<1x12x16xf32> to vector<12x16xf32>
    %c0_115 = arith.constant 0 : index
    %c22_116 = arith.constant 22 : index
    %137 = vector.load %arg12[%c0_115, %c22_116] : memref<16x110xf32, #tpu.memory_space<vmem>>, vector<16x80xf32>
    %cst_117 = arith.constant dense<0.000000e+00> : vector<12x80xf32>
    %138 = tpu.matmul %136, %137, %cst_117 {dimension_numbers = #tpu.dot_dimension_numbers<[1], [0], [0], [1], [0, 0, 1, 1], [], []>} : vector<12x16xf32>, vector<16x80xf32>, vector<12x80xf32> -> vector<12x80xf32>
    %139 = arith.addf %134, %138 : vector<12x80xf32>
    %c0_118 = arith.constant 0 : index
    %c0_119 = arith.constant 0 : index
    %140 = vector.load %arg10[%c0_118, %c0_119] : memref<12x1xf32, #tpu.memory_space<vmem>>, vector<12x1xf32>
    %141 = vector.broadcast %140 : vector<12x1xf32> to vector<12x80xf32>
    %142 = arith.addf %139, %141 : vector<12x80xf32>
    %c0_120 = arith.constant 0 : index
    %c0_121 = arith.constant 0 : index
    %c0_122 = arith.constant 0 : index
    %143 = vector.load %arg11[%c0_120, %c0_121, %c0_122] : memref<1x12x80xf32, #tpu.memory_space<vmem>>, vector<1x12x80xf32>
    %144 = vector.shape_cast %143 : vector<1x12x80xf32> to vector<12x80xf32>
    %145 = vector.shape_cast %142 : vector<12x80xf32> to vector<1x12x80xf32>
    tpu.vector_store %arg11[%c0_120, %c0_121, %c0_122], %145 {strides = array<i32>} : memref<1x12x80xf32, #tpu.memory_space<vmem>>, vector<1x12x80xf32>,
    return
  }
  func.func @transform_0(%arg0: i32) -> (i32, i32, i32) {
    %c0_i32 = arith.constant 0 : i32
    %c0_i32_0 = arith.constant 0 : i32
    %c0_i32_1 = arith.constant 0 : i32
    return %arg0, %c0_i32, %c0_i32_0 : i32, i32, i32
  }
  func.func @transform_1(%arg0: i32) -> (i32, i32) {
    %c0_i32 = arith.constant 0 : i32
    %c0_i32_0 = arith.constant 0 : i32
    %c0_i32_1 = arith.constant 0 : i32
    return %c0_i32, %c0_i32_0 : i32, i32
  }
  func.func @transform_2(%arg0: i32) -> (i32, i32) {
    %c0_i32 = arith.constant 0 : i32
    %c0_i32_0 = arith.constant 0 : i32
    %c0_i32_1 = arith.constant 0 : i32
    return %c0_i32, %c0_i32_0 : i32, i32
  }
  func.func @transform_3(%arg0: i32) -> (i32, i32) {
    %c0_i32 = arith.constant 0 : i32
    %c0_i32_0 = arith.constant 0 : i32
    %c0_i32_1 = arith.constant 0 : i32
    return %c0_i32, %c0_i32_0 : i32, i32
  }
  func.func @transform_4(%arg0: i32) -> (i32, i32, i32) {
    %c0_i32 = arith.constant 0 : i32
    %c0_i32_0 = arith.constant 0 : i32
    %c0_i32_1 = arith.constant 0 : i32
    %c0_i32_2 = arith.constant 0 : i32
    return %c0_i32, %c0_i32_0, %c0_i32_1 : i32, i32, i32
  }
  func.func @transform_5(%arg0: i32) -> (i32, i32) {
    %c0_i32 = arith.constant 0 : i32
    %c0_i32_0 = arith.constant 0 : i32
    %c0_i32_1 = arith.constant 0 : i32
    return %c0_i32, %c0_i32_0 : i32, i32
  }
  func.func @transform_6(%arg0: i32) -> (i32, i32) {
    %c0_i32 = arith.constant 0 : i32
    %c0_i32_0 = arith.constant 0 : i32
    %c0_i32_1 = arith.constant 0 : i32
    return %c0_i32, %c0_i32_0 : i32, i32
  }
  func.func @transform_7(%arg0: i32) -> (i32, i32) {
    %c0_i32 = arith.constant 0 : i32
    %c0_i32_0 = arith.constant 0 : i32
    %c0_i32_1 = arith.constant 0 : i32
    return %c0_i32, %c0_i32_0 : i32, i32
  }
  func.func @transform_8(%arg0: i32) -> (i32, i32, i32) {
    %c0_i32 = arith.constant 0 : i32
    %c0_i32_0 = arith.constant 0 : i32
    %c0_i32_1 = arith.constant 0 : i32
    %c0_i32_2 = arith.constant 0 : i32
    return %c0_i32, %c0_i32_0, %c0_i32_1 : i32, i32, i32
  }
  func.func @transform_9(%arg0: i32) -> (i32, i32) {
    %c0_i32 = arith.constant 0 : i32
    %c0_i32_0 = arith.constant 0 : i32
    %c0_i32_1 = arith.constant 0 : i32
    return %c0_i32, %c0_i32_0 : i32, i32
  }
  func.func @transform_10(%arg0: i32) -> (i32, i32, i32) {
    %c0_i32 = arith.constant 0 : i32
    %c0_i32_0 = arith.constant 0 : i32
    %c0_i32_1 = arith.constant 0 : i32
    return %arg0, %c0_i32, %c0_i32_0 : i32, i32, i32
  }
}

</mosaic_0001>

<bundles_post_ra>
// kernel: tile.8
= control target key start
LH: loop header
LB: loop body
LE: loop exit
PB: predicated region body
PF: predicated region fallthrough
CT: control target
= control target key end

     0   :  { %s22_s0 = inlined_call_operand.vmem [shape: f32[3], index: 0, kind: input, shape index: {}]   ;;  %s23_s1 = inlined_call_operand.vmem [shape: f32[4,3], index: 1, kind: output, shape index: {}]  }
   0x1   :  { %v4_v0 = vld [vmem:[%s22_s0] ss:$0 sm:$0xff] }
   0x2   :  { %5 = vst [vmem:[%s23_s1] sm:$0xf] %v4_v0 }

// kernel: tile.0
= control target key start
LH: loop header
LB: loop body
LE: loop exit
PB: predicated region body
PF: predicated region fallthrough
CT: control target
= control target key end

     0   :  { %vm7_vm0 = vcmask 7168   ;;  %s26_s10 = smov 126   ;;  %s49_s0 = inlined_call_operand.vmem [shape: f32[4,3], index: 0, kind: input, shape index: {}]   ;;  %s50_s1 = inlined_call_operand.vmem [shape: f32[12,1], index: 1, kind: output, shape index: {}]  }
   0x1   :  { %v4_v0 = vld [vmem:[%s49_s0] sm:$0xf]  ;;  %s25_s0 = smov 127  }
   0x2   :  { %5 = vst [vmem:[#allocation0] sm:$0xf] %v4_v0 }
   0x9   :  { %v9_v1 = vld [vmem:[#allocation0] sm:$0xf]  }
   0xa   :  { %v6_v2 = vld [vmem:[#allocation0] sm:$0xf]   ;;  %10 = vrot.lane.b32.xlu0 %v9_v1, %s25_s0 }
   0xb   :  { %8 = vst.msk [vmem:[%s50_s1] ss:$3 sm:$0xf] %vm7_vm0, %v6_v2   ;;  %v15_v3 = vld [vmem:[#allocation0] sm:$0xf]  }
   0xe   :  { %16 = vrot.lane.b32.xlu0 %v15_v3, %s26_s10 }
  0x7c   :  { %v11_v4 = vpop.permute.xlu0 %10  }
  0x7d   :  { %21 = vst.msk [vmem:[%s50_s1 + $0x1] ss:$3 sm:$0xf] %vm7_vm0, %v11_v4  }
  0x80   :  { %v17_v5 = vpop.permute.xlu0 %16  }
  0x81   :  { %22 = vst.msk [vmem:[%s50_s1 + $0x2] ss:$3 sm:$0xf] %vm7_vm0, %v17_v5  }

// kernel: mobilenet_forward.1
= control target key start
LH: loop header
LB: loop body
LE: loop exit
PB: predicated region body
PF: predicated region fallthrough
CT: control target
= control target key end

     0   :  { %s2145_s13 = smov 0   ;;  %s2399_s0 = inlined_call_operand.vmem [shape: f32[2,27,80], index: 0, kind: input, shape index: {}]   ;;  %s2400_s1 = inlined_call_operand.vmem [shape: f32[1,80], index: 1, kind: input, shape index: {}]   ;;  %s2401_s2 = inlined_call_operand.vmem [shape: f32[16,27], index: 2, kind: input, shape index: {}]   ;;  %s2402_s3 = inlined_call_operand.vmem [shape: f32[16,1], index: 3, kind: input, shape index: {}]   ;;  %s2403_s4 = inlined_call_operand.vmem [shape: f32[9,16,1], index: 4, kind: input, shape index: {}]   ;;  %s2404_s5 = inlined_call_operand.vmem [shape: f32[16,1], index: 5, kind: input, shape index: {}]   ;;  %s2405_s6 = inlined_call_operand.vmem [shape: f32[16,16], index: 6, kind: input, shape index: {}]   ;;  %s2406_s7 = inlined_call_operand.vmem [shape: f32[16,1], index: 7, kind: input, shape index: {}]   ;;  %s2407_s8 = inlined_call_operand.vmem [shape: f32[9,12,16], index: 8, kind: input, shape index: {}]   ;;  %s2408_s9 = inlined_call_operand.vmem [shape: f32[12,1], index: 9, kind: input, shape index: {}]   ;;  %s2409_s10 = inlined_call_operand.vmem [shape: f32[2,12,80], index: 10, kind: output, shape index: {}]  }
   0x1 LB: > { %s1746_s14 = sadd.s32 4294967295, %s2076_s13   ;;  %p1750_p0 = scmp.ge.s32.totalorder %s2076_s13, 1  ;;  %s2076_s13 = sphi %s2145_s13, %s20_s13  }
   0x2   : > { %p312_p1 = scmp.lt.s32.totalorder %s2076_s13, 3 }
   0x4   : > { %p313_p2 = pnand %p1750_p0, %p312_p1 }
   0x5   : > { %p350_p3 = scmp.lt.s32.totalorder (!%p313_p2), %s1746_s14, 1  ;;  %v361_v0 = vld [vmem:[%s2401_s2] sm:$0xff] (!%p313_p2)  ;;  %vm379_vm0 = vcmask (!%p313_p2), 220160   ;;  %v2078_v2 = vmov (!%p313_p2), 0   ;;  %v368_v3 = vld [vmem:[%s2402_s3 + $0x8] sm:$0xff] (!%p313_p2)  ;;  %vm386_vm1 = vcmask (!%p313_p2), 1042432  }
   0x6   : > { %316 = sbr.rel (%p313_p2) target bundleno = 1262 (0x4ee), region = 60  ;;  %1869 = vmatprep.mubr.msk.f32.mxu0 (!%p313_p2), %vm379_vm0, %v361_v0  ;;  %v367_v1 = vld [vmem:[%s2402_s3] sm:$0xff] (!%p313_p2)  ;;  %2028 = vset.pattern.permute.xlu0 (!%p313_p2), %v2078_v2  ;;  %vm2079_vm2 = vmmov (!%p313_p2), 1   ;;  %v1759_v10 = vld [vmem:[%s2403_s4 + $0x10] sm:$0xff] (!%p313_p2)  ;;  %v362_v12 = vld [vmem:[%s2401_s2 + $0x8] sm:$0xff] (!%p313_p2)  ;;  %vm475_vm4 = vcmask (!%p313_p2), 89088  }
   0x7   : > { %2029 = vset.pattern.permute.xlu1 (!%p313_p2), %v2078_v2  ;;  %371 = vperm.xlu0 (!%p313_p2), %2028, %v367_v1   ;;  %vm1947_vm3 = vmpackc.low (!%p313_p2), %vm386_vm1, %vm2079_vm2  ;;  %v1761_v11 = vld [vmem:[%s2403_s4 + $0x20] sm:$0xff] (!%p313_p2)  ;;  %v1763_v13 = vld [vmem:[%s2403_s4 + $0x30] sm:$0xff] (!%p313_p2)  ;;  %vm478_vm5 = vcmask (!%p313_p2), 900824   ;;  %v2080_v25 = vmov (!%p313_p2), 0.0   ;;  %s2081_s21 = smov (!%p313_p2), 11   ;;  %vm497_vm6 = vcmask (!%p313_p2), 744536  }
   0x8   : > { %v1765_v14 = vld [vmem:[%s2403_s4 + $0x40] sm:$0xff] (!%p313_p2)  ;;  %v1760_v15 = vld [vmem:[%s2403_s4 + $0x18] sm:$0xff] (!%p313_p2)  ;;  %v1767_v16 = vld [vmem:[%s2403_s4 + $0x50] sm:$0xff] (!%p313_p2)  ;;  %477 = vst.msk [vmem:[#allocation2 + $0x8] sm:$0xff] (!%p313_p2), %vm475_vm4, %v2080_v25  ;;  %s2082_s16 = smov (!%p313_p2), 127   ;;  %s2083_s17 = smov (!%p313_p2), 126  }
   0x9   : > { %528 = vperm.xlu1 (!%p313_p2), %2029, %v1760_v15   ;;  %v1762_v17 = vld [vmem:[%s2403_s4 + $0x28] sm:$0xff] (!%p313_p2)  ;;  %v1769_v18 = vld [vmem:[%s2403_s4 + $0x60] sm:$0xff] (!%p313_p2)  ;;  %v1764_v19 = vld [vmem:[%s2403_s4 + $0x38] sm:$0xff] (!%p313_p2)  ;;  %476 = vst.msk [vmem:[#allocation2] sm:$0xff] (!%p313_p2), %vm475_vm4, %v2080_v25  ;;  %s2084_s18 = smov (!%p313_p2), 118   ;;  %s2086_s20 = smov (!%p313_p2), 116  }
   0xa   : > { %v1771_v20 = vld [vmem:[%s2403_s4 + $0x70] sm:$0xff] (!%p313_p2)  ;;  %v1766_v21 = vld [vmem:[%s2403_s4 + $0x48] sm:$0xff] (!%p313_p2)  ;;  %v1773_v22 = vld [vmem:[%s2403_s4 + $0x80] sm:$0xff] (!%p313_p2)  ;;  %480 = vst.msk [vmem:[#allocation2 + $0x8] sm:$0xff] (!%p313_p2), %vm478_vm5, %v2080_v25  ;;  %s2087_s22 = smov (!%p313_p2), 108   ;;  %s2088_s23 = smov (!%p313_p2), 107  }
   0xb   : > { %376 = vperm.xlu0 (!%p313_p2), %2028, %v368_v3   ;;  %v500_v23 = vld [vmem:[%s2403_s4] sm:$0xff] (!%p313_p2)  ;;  %479 = vst.msk [vmem:[#allocation2] sm:$0xff] (!%p313_p2), %vm478_vm5, %v2080_v25  ;;  %v1768_v45 = vld [vmem:[%s2403_s4 + $0x58] sm:$0xff] (!%p313_p2)  ;;  %v1770_v46 = vld [vmem:[%s2403_s4 + $0x68] sm:$0xff] (!%p313_p2)  ;;  %vm748_vm7 = vcmask (!%p313_p2), 130048   ;;  %vm1689_vm8 = vcmask (!%p313_p2), 650240  }
   0xc   : > { %v718_v24 = vld [vmem:[%s2404_s5] sm:$0xff] (!%p313_p2)  ;;  %v1772_v47 = vld [vmem:[%s2403_s4 + $0x78] sm:$0xff] (!%p313_p2)  ;;  %v1774_v48 = vld [vmem:[%s2403_s4 + $0x88] sm:$0xff] (!%p313_p2)  ;;  %vm1687_vm9 = vcmask (!%p313_p2), 654336  }
   0xd   : > { %s2411_s14 = smov (!%p350_p3, %s1746_s14), 1  ;;  %553 = vperm.xlu1 %2029, %v1762_v17   ;;  %v2218_v40 = vld [vmem:[%s2400_s1] ss:$0 sm:$0xff]  ;;  %v501_v49 = vld [vmem:[%s2403_s4 + $0x8] sm:$0xff] }
   0xe   : > { %s1813_s19 = sshll.u32 %s2411_s14, 5  ;;  %v719_v50 = vld [vmem:[%s2404_s5 + $0x8] sm:$0xff]  ;;  %v736_v25 = vld [vmem:[%s2406_s7] sm:$0xff] }
   0xf   : > { %s354_s24 = scalar_lea.vmem %s2399_s0, %s1813_s19  ;;  %523 = vperm.xlu0 %2028, %v1759_v10   ;;  %s2085_s19 = smov 117  }
  0x10   : > { %v363_v4 = vld [vmem:[%s354_s24] sm:$0xff]  ;;  %v364_v5 = vld [vmem:[%s354_s24 + $0x8] sm:$0xff]  ;;  %v365_v6 = vld [vmem:[%s354_s24 + $0x10] sm:$0xff] }
  0x11   : > { %v1942_v7 = vpack.c.bf16 %v364_v5, %v363_v4  ;;  %v366_v8 = vld [vmem:[%s354_s24 + $0x18] sm:$0x7]  ;;  %578 = vperm.xlu1 %2029, %v1764_v19   ;;  %s2089_s24 = smov 106  }
  0x12   : > { %v1946_v9 = vpack.c.bf16 %v366_v8, %v365_v6 }
  0x13   : > { %1943 = vmatprep.subr.bf16.mxu0 %v1942_v7  ;;  %548 = vperm.xlu0 %2028, %v1761_v11  }
  0x14   : > { %1945 = vmatpush3.bf16.msra.mxu0 %v1942_v7 }
  0x15   : > { %1948 = vmatprep.subr.msk.bf16.mxu0 %vm1947_vm3, %v1946_v9  ;;  %603 = vperm.xlu1 %2029, %v1766_v21   ;;  %v734_v21 = vld [vmem:[%s2405_s6] sm:$0xff] }
  0x17   : > { %573 = vperm.xlu0 %2028, %v1763_v13  }
  0x18   : > { %1951 = vmatpush3.bf16.msk.msra.mxu0 %vm1947_vm3, %v1946_v9 }
  0x1b   : > { %1870 = vmatmul.mubr.msk.f32.vlgmr.msra.gmra.mrb[0].mxu0 %vm379_vm0, %v362_v12  ;;  %598 = vperm.xlu0 %2028, %v1765_v14  }
  0x1c   : > { %1876 = vmatprep.mubr.msk.f32.mxu0 %vm748_vm7, %v734_v21  ;;  %v1787_v21 = vld [vmem:[%s2407_s8 + $0x30] sm:$0xff] }
  0x1d   : > { %1904 = vmatprep.mubr.msk.f32.mxu1 %vm748_vm7, %v1787_v21 }
  0x1f   : > { %623 = vperm.xlu0 %2028, %v1767_v16  }
  0x23   : > { %648 = vperm.xlu0 %2028, %v1769_v18  }
  0x27   : > { %673 = vperm.xlu0 %2028, %v1771_v20  }
  0x2b   : > { %698 = vperm.xlu0 %2028, %v1773_v22  }
  0x2f   : > { %506 = vperm.xlu0 %2028, %v500_v23   ;;  %v737_v23 = vld [vmem:[%s2406_s7 + $0x8] sm:$0xff] }
  0x33   : > { %722 = vperm.xlu0 %2028, %v718_v24  }
  0x86   : > { %v372_v26 = vpop.permute.xlu0 %371 }
  0x88   : > { %v529_v51 = vpop.permute.xlu1 %528 }
  0x8a   : > { %v377_v27 = vpop.permute.xlu0 %376 }
  0x8c   : > { %v554_v52 = vpop.permute.xlu1 %553 }
  0x8e   : > { %v524_v55 = vpop.permute.xlu0 %523 }
  0x90   : > { %v579_v53 = vpop.permute.xlu1 %578 }
  0x92   : > { %v549_v57 = vpop.permute.xlu0 %548 }
  0x94   : > { %v604_v54 = vpop.permute.xlu1 %603 }
  0x96   : > { %v574_v61 = vpop.permute.xlu0 %573 }
  0x9a   : > { %v599_v1 = vpop.permute.xlu0 %598 }
  0x9e   : > { %v624_v7 = vpop.permute.xlu0 %623 }
  0xa2   : > { %v649_v11 = vpop.permute.xlu0 %648 }
  0xa6   : > { %v674_v17 = vpop.permute.xlu0 %673 }
  0xaa   : > { %v699_v22 = vpop.permute.xlu0 %698 }
  0xee   : > { %v1871_v28 = vpop.f32.mrb[0].mxu0 }
  0xef   : > { %v462_v29 = vadd.f32 %v1871_v28, %v377_v27  ;;  %v456_v30 = vpop.f32.mrb[1].mxu0  ;;  %v507_v27 = vpop.permute.xlu0 %506 }
  0xf0   : > { %v457_v31 = vadd.f32 %v456_v30, %v372_v26 }
  0xf1   : > { %v466_v32 = vadd.f32 3.0, %v462_v29 }
  0xf2   : > { %v465_v33 = vadd.f32 3.0, %v457_v31 }
  0xf3   : > { %v468_v34 = vmax.f32 %v466_v32, 0.0 }
  0xf4   : > { %v467_v35 = vmax.f32 %v465_v33, 0.0 }
  0xf5   : > { %v470_v36 = vmin.f32 %v468_v34, 6.0 }
  0xf6   : > { %v469_v37 = vmin.f32 %v467_v35, 6.0 }
  0xf7   : > { %v472_v38 = vmul.f32 %v470_v36, %v462_v29  ;;  %v723_v29 = vpop.permute.xlu0 %722 }
  0xf8   : > { %v471_v39 = vmul.f32 %v469_v37, %v457_v31 }
  0xf9   : > { %v474_v41 = vmul.f32 0.16666667, %v472_v38 }
  0xfa   : > { %v473_v42 = vmul.f32 0.16666667, %v471_v39 }
  0xfb   : > { %v488_v43 = vmul.f32 %v2218_v40, %v474_v41 }
  0xfc   : > { %v487_v44 = vmul.f32 %v2218_v40, %v473_v42 }
  0xfd   : > { %493 = vrot.lane.b32.xlu1 %v488_v43, %s2081_s21 }
 0x101   : > { %491 = vrot.lane.b32.xlu1 %v487_v44, %s2081_s21 }
 0x105   : > { %628 = vperm.xlu1 %2029, %v1768_v45  }
 0x109   : > { %653 = vperm.xlu1 %2029, %v1770_v46  }
 0x10d   : > { %678 = vperm.xlu1 %2029, %v1772_v47  }
 0x111   : > { %703 = vperm.xlu1 %2029, %v1774_v48  }
 0x115   : > { %511 = vperm.xlu1 %2029, %v501_v49  }
 0x119   : > { %727 = vperm.xlu1 %2029, %v719_v50  }
 0x16f   : > { %v494_v56 = vpop.permute.xlu1 %493 }
 0x170   : > { %499 = vst.msk [vmem:[#allocation2 + $0x8] sm:$0xff] %vm497_vm6, %v494_v56 }
 0x173   : > { %v492_v58 = vpop.permute.xlu1 %491 }
 0x174   : > { %498 = vst.msk [vmem:[#allocation2] sm:$0xff] %vm497_vm6, %v492_v58 }
 0x177   : > { %v2244_v59 = vld [vmem:[#allocation2 + $0x8] sm:$0xff] }
 0x178   : > { %v532_v60 = vmul.f32 %v529_v51, %v2244_v59  ;;  %v557_v63 = vmul.f32 %v554_v52, %v2244_v59  ;;  %v582_v2 = vmul.f32 %v579_v53, %v2244_v59  ;;  %v607_v5 = vmul.f32 %v604_v54, %v2244_v59 }
 0x17a   : > { %537 = vrot.lane.b32.xlu1 %v532_v60, %s2082_s16 }
 0x17b   : > { %v2248_v62 = vld [vmem:[#allocation2] sm:$0xff] }
 0x17c   : > { %v531_v0 = vmul.f32 %v524_v55, %v2248_v62  ;;  %v556_v3 = vmul.f32 %v549_v57, %v2248_v62  ;;  %v581_v6 = vmul.f32 %v574_v61, %v2248_v62  ;;  %v606_v10 = vmul.f32 %v599_v1, %v2248_v62 }
 0x17d   : > { %v631_v14 = vmul.f32 %v624_v7, %v2248_v62  ;;  %v656_v16 = vmul.f32 %v649_v11, %v2248_v62  ;;  %v681_v20 = vmul.f32 %v674_v17, %v2248_v62  ;;  %v706_v24 = vmul.f32 %v699_v22, %v2248_v62 }
 0x17e   : > { %562 = vrot.lane.b32.xlu1 %v557_v63, %s2083_s17  ;;  %535 = vrot.lane.b32.xlu0 %v531_v0, %s2082_s16  ;;  %v514_v42 = vmul.f32 %v507_v27, %v2248_v62  ;;  %v1673_v27 = vld [vmem:[%s2408_s9] sm:$0xff] }
 0x182   : > { %587 = vrot.lane.b32.xlu1 %v582_v2, %s2084_s18  ;;  %560 = vrot.lane.b32.xlu0 %v556_v3, %s2083_s17 }
 0x184   : > { %v629_v4 = vpop.permute.xlu1 %628 }
 0x185   : > { %v632_v8 = vmul.f32 %v629_v4, %v2244_v59 }
 0x186   : > { %612 = vrot.lane.b32.xlu1 %v607_v5, %s2085_s19  ;;  %585 = vrot.lane.b32.xlu0 %v581_v6, %s2084_s18  ;;  %v735_v6 = vld [vmem:[%s2405_s6 + $0x8] sm:$0xff] }
 0x188   : > { %v654_v9 = vpop.permute.xlu1 %653 }
 0x189   : > { %v657_v12 = vmul.f32 %v654_v9, %v2244_v59 }
 0x18a   : > { %610 = vrot.lane.b32.xlu0 %v606_v10, %s2085_s19  ;;  %637 = vrot.lane.b32.xlu1 %v632_v8, %s2086_s20 }
 0x18c   : > { %v679_v13 = vpop.permute.xlu1 %678 }
 0x18d   : > { %v682_v15 = vmul.f32 %v679_v13, %v2244_v59 }
 0x18e   : > { %635 = vrot.lane.b32.xlu0 %v631_v14, %s2086_s20  ;;  %662 = vrot.lane.b32.xlu1 %v657_v12, %s2087_s22 }
 0x190   : > { %v704_v18 = vpop.permute.xlu1 %703 }
 0x191   : > { %v707_v19 = vmul.f32 %v704_v18, %v2244_v59 }
 0x192   : > { %660 = vrot.lane.b32.xlu0 %v656_v16, %s2087_s22  ;;  %687 = vrot.lane.b32.xlu1 %v682_v15, %s2088_s23 }
 0x194   : > { %v512_v26 = vpop.permute.xlu1 %511 }
 0x195   : > { %v515_v37 = vmul.f32 %v512_v26, %v2244_v59  ;;  %v1674_v26 = vld [vmem:[%s2408_s9 + $0x8] sm:$0xf] }
 0x196   : > { %685 = vrot.lane.b32.xlu0 %v681_v20, %s2088_s23  ;;  %712 = vrot.lane.b32.xlu1 %v707_v19, %s2089_s24 }
 0x198   : > { %v728_v28 = vpop.permute.xlu1 %727 }
 0x19a   : > { %710 = vrot.lane.b32.xlu0 %v706_v24, %s2089_s24  ;;  %745 = vperm.xlu1 %2029, %v737_v23  }
 0x19e   : > { %740 = vperm.xlu0 %2028, %v736_v25   ;;  %834 = vrot.lane.b32.xlu1 %v2244_v59, %s2085_s19 }
 0x1a2   : > { %832 = vrot.lane.b32.xlu0 %v2248_v62, %s2085_s19 }
 0x1ec   : > { %v538_v30 = vpop.permute.xlu1 %537 }
 0x1ed   : > { %v542_v38 = vadd.f32 %v538_v30, %v515_v37 }
 0x1f0   : > { %v536_v31 = vpop.permute.xlu0 %535  ;;  %v563_v32 = vpop.permute.xlu1 %562 }
 0x1f1   : > { %v567_v43 = vadd.f32 %v563_v32, %v542_v38  ;;  %v541_v44 = vadd.f32 %v536_v31, %v514_v42 }
 0x1f4   : > { %v561_v33 = vpop.permute.xlu0 %560  ;;  %v588_v34 = vpop.permute.xlu1 %587 }
 0x1f5   : > { %v592_v45 = vadd.f32 %v588_v34, %v567_v43  ;;  %v566_v48 = vadd.f32 %v561_v33, %v541_v44  ;;  %v1788_v43 = vld [vmem:[%s2407_s8 + $0x38] sm:$0xf] }
 0x1f8   : > { %v586_v35 = vpop.permute.xlu0 %585  ;;  %v613_v36 = vpop.permute.xlu1 %612 }
 0x1f9   : > { %v617_v49 = vadd.f32 %v613_v36, %v592_v45  ;;  %v591_v50 = vadd.f32 %v586_v35, %v566_v48  ;;  %v1778_v48 = vld [vmem:[%s2407_s8 + $0x18] sm:$0xf] }
 0x1fc   : > { %v611_v39 = vpop.permute.xlu0 %610  ;;  %v638_v41 = vpop.permute.xlu1 %637 }
 0x1fd   : > { %v642_v51 = vadd.f32 %v638_v41, %v617_v49  ;;  %v616_v54 = vadd.f32 %v611_v39, %v591_v50  ;;  %v852_v49 = vld [vmem:[%s2407_s8] sm:$0xff] }
 0x200   : > { %v636_v46 = vpop.permute.xlu0 %635  ;;  %v663_v47 = vpop.permute.xlu1 %662 }
 0x201   : > { %v667_v55 = vadd.f32 %v663_v47, %v642_v51  ;;  %v641_v56 = vadd.f32 %v636_v46, %v616_v54  ;;  %v1791_v47 = vld [vmem:[%s2407_s8 + $0x40] sm:$0xff] }
 0x204   : > { %v661_v52 = vpop.permute.xlu0 %660  ;;  %v688_v53 = vpop.permute.xlu1 %687 }
 0x205   : > { %v692_v57 = vadd.f32 %v688_v53, %v667_v55  ;;  %v666_v60 = vadd.f32 %v661_v52, %v641_v56  ;;  %v1792_v55 = vld [vmem:[%s2407_s8 + $0x48] sm:$0xf] }
 0x208   : > { %v686_v58 = vpop.permute.xlu0 %685  ;;  %v713_v59 = vpop.permute.xlu1 %712 }
 0x209   : > { %v717_v61 = vadd.f32 %v713_v59, %v692_v57  ;;  %v691_v62 = vadd.f32 %v686_v58, %v666_v60  ;;  %v1795_v57 = vld [vmem:[%s2407_s8 + $0x50] sm:$0xff]  ;;  %v853_v60 = vld [vmem:[%s2407_s8 + $0x8] sm:$0xf] }
 0x20b   : > { %v731_v0 = vadd.f32 %v728_v28, %v717_v61  ;;  %v1783_v61 = vld [vmem:[%s2407_s8 + $0x20] sm:$0xff] }
 0x20c   : > { %v711_v63 = vpop.permute.xlu0 %710 }
 0x20d   : > { %v716_v1 = vadd.f32 %v711_v63, %v691_v62  ;;  %v733_v3 = vmax.f32 %v731_v0, 0.0  ;;  %v1796_v0 = vld [vmem:[%s2407_s8 + $0x58] sm:$0xf] }
 0x20f   : > { %v730_v2 = vadd.f32 %v723_v29, %v716_v1  ;;  %v1799_v1 = vld [vmem:[%s2407_s8 + $0x60] sm:$0xff] }
 0x211   : > { %v732_v4 = vmax.f32 %v730_v2, 0.0 }
 0x213   : > { %v1952_v5 = vpack.c.bf16 %v733_v3, %v732_v4  ;;  %v1784_v4 = vld [vmem:[%s2407_s8 + $0x28] sm:$0xf] }
 0x215   : > { %1953 = vmatprep.subr.bf16.mxu0 %v1952_v5 }
 0x216   : > { %1955 = vmatpush3.bf16.msra.mxu0 %v1952_v5 }
 0x219   : > { %1877 = vmatmul.mubr.msk.f32.vlgmr.msra.gmra.mrb[2].mxu0 %vm748_vm7, %v735_v6  ;;  %v746_v7 = vpop.permute.xlu1 %745 }
 0x21d   : > { %v741_v8 = vpop.permute.xlu0 %740  ;;  %v835_v12 = vpop.permute.xlu1 %834 }
 0x221   : > { %v833_v14 = vpop.permute.xlu0 %832 }
 0x2ec   : > { %v1878_v9 = vpop.f32.mrb[2].mxu0 }
 0x2ed   : > { %v827_v10 = vadd.f32 %v1878_v9, %v746_v7  ;;  %v821_v11 = vpop.f32.mrb[3].mxu0  ;;  %v1800_v7 = vld [vmem:[%s2407_s8 + $0x68] sm:$0xf] }
 0x2ee   : > { %v822_v13 = vadd.f32 %v821_v11, %v741_v8  ;;  %v1803_v8 = vld [vmem:[%s2407_s8 + $0x70] sm:$0xff]  ;;  %v1807_v11 = vld [vmem:[%s2407_s8 + $0x80] sm:$0xff] }
 0x2ef   : > { %v839_v15 = vadd.f32 %v835_v12, %v827_v10  ;;  %v1804_v10 = vld [vmem:[%s2407_s8 + $0x78] sm:$0xf]  ;;  %v1808_v12 = vld [vmem:[%s2407_s8 + $0x88] sm:$0xf] }
 0x2f0   : > { %v838_v16 = vadd.f32 %v833_v14, %v822_v13 }
 0x2f1   : > { %v841_v17 = vmul.f32 %v2218_v40, %v839_v15 }
 0x2f2   : > { %v840_v18 = vmul.f32 %v2218_v40, %v838_v16  ;;  %v1777_v40 = vld [vmem:[%s2407_s8 + $0x10] sm:$0xff] }
 0x2f3   : > { %846 = vrot.lane.b32.xlu1 %v841_v17, %s2081_s21  ;;  %1883 = vmatprep.mubr.msk.f32.mxu0 %vm748_vm7, %v1777_v40 }
 0x2f4   : > { %844 = vrot.lane.b32.xlu0 %v840_v18, %s2081_s21  ;;  %s1814_s21 = sshll.u32 %s2411_s14, 4 }
 0x2f5   : > { %s359_s29 = scalar_lea.vmem %s2409_s10, %s1814_s21 }
 0x365   : > { %v847_v19 = vpop.permute.xlu1 %846 }
 0x366   : > { %851 = vst.msk [vmem:[#allocation2 + $0x8] sm:$0xff] %vm497_vm6, %v847_v19  ;;  %v845_v20 = vpop.permute.xlu0 %844 }
 0x367   : > { %850 = vst.msk [vmem:[#allocation2] sm:$0xff] %vm497_vm6, %v845_v20 }
 0x36d   : > { %v855_v22 = vld [vmem:[#allocation2 + $0x8] sm:$0xff] }
 0x36e   : > { %v854_v23 = vld [vmem:[#allocation2] sm:$0xff] }
 0x36f   : > { %v2035_v24 = vpack.i.bf16 %v855_v22, %v854_v23  ;;  %v1960_v25 = vpack.c.bf16 %v855_v22, %v854_v23 }
 0x371   : > { %2036 = vrot.lane.b32.xlu1 %v2035_v24, %s2085_s19  ;;  %2031 = vrot.lane.b32.xlu0 %v2035_v24, %s2084_s18 }
 0x375   : > { %2046 = vrot.lane.b32.xlu1 %v2035_v24, %s2082_s16  ;;  %2041 = vrot.lane.b32.xlu0 %v2035_v24, %s2086_s20 }
 0x379   : > { %2056 = vrot.lane.b32.xlu1 %v2035_v24, %s2088_s23  ;;  %2051 = vrot.lane.b32.xlu0 %v2035_v24, %s2087_s22 }
 0x37d   : > { %2066 = vrot.lane.b32.xlu1 %v2035_v24, %s2089_s24  ;;  %2061 = vrot.lane.b32.xlu0 %v2035_v24, %s2083_s17 }
 0x381   : > { %1682 = vperm.xlu1 %2029, %v1674_v26   ;;  %1677 = vperm.xlu0 %2028, %v1673_v27  }
 0x3e3   : > { %v2037_v28 = vpop.permute.xlu1 %2036  ;;  %v2032_v29 = vpop.permute.xlu0 %2031 }
 0x3e4   : > { %v2039_v30 = vunpack.i.h.bf16 %v2037_v28  ;;  %v2038_v31 = vunpack.i.l.bf16 %v2037_v28  ;;  %v2034_v32 = vunpack.i.h.bf16 %v2032_v29  ;;  %v2033_v33 = vunpack.i.l.bf16 %v2032_v29 }
 0x3e6   : > { %v1968_v34 = vpack.c.bf16 %v2034_v32, %v2033_v33  ;;  %v1972_v35 = vpack.c.bf16 %v2039_v30, %v2038_v31 }
 0x3e7   : > { %v2047_v36 = vpop.permute.xlu1 %2046  ;;  %v2042_v37 = vpop.permute.xlu0 %2041 }
 0x3e8   : > { %v2049_v38 = vunpack.i.h.bf16 %v2047_v36  ;;  %v2048_v39 = vunpack.i.l.bf16 %v2047_v36  ;;  %v2044_v41 = vunpack.i.h.bf16 %v2042_v37  ;;  %v2043_v42 = vunpack.i.l.bf16 %v2042_v37  ;;  %1969 = vmatprep.subr.bf16.mxu1 %v1968_v34 }
 0x3e9   : > { %1971 = vmatpush3.bf16.msra.mxu1 %v1968_v34 }
 0x3ea   : > { %v1956_v44 = vpack.c.bf16 %v2049_v38, %v2048_v39  ;;  %1973 = vmatprep.subr.bf16.mxu1 %v1972_v35  ;;  %v1976_v46 = vpack.c.bf16 %v2044_v41, %v2043_v42 }
 0x3eb   : > { %v2052_v45 = vpop.permute.xlu0 %2051  ;;  %v2057_v59 = vpop.permute.xlu1 %2056 }
 0x3ec   : > { %1957 = vmatprep.subr.bf16.mxu0 %v1956_v44  ;;  %1905 = vmatmul.mubr.msk.f32.vlgmr.msra.gmra.mrb[0].mxu1 %vm748_vm7, %v1788_v43  ;;  %v2054_v51 = vunpack.i.h.bf16 %v2052_v45  ;;  %v2053_v52 = vunpack.i.l.bf16 %v2052_v45  ;;  %v2059_v62 = vunpack.i.h.bf16 %v2057_v59  ;;  %v2058_v63 = vunpack.i.l.bf16 %v2057_v59 }
 0x3ed   : > { %1959 = vmatpush3.bf16.msra.mxu0 %v1956_v44  ;;  %1975 = vmatpush3.bf16.msra.mxu1 %v1972_v35 }
 0x3ee   : > { %1961 = vmatprep.subr.bf16.mxu0 %v1960_v25  ;;  %1977 = vmatprep.subr.bf16.mxu1 %v1976_v46  ;;  %v1980_v58 = vpack.c.bf16 %v2054_v51, %v2053_v52  ;;  %v1984_v2 = vpack.c.bf16 %v2059_v62, %v2058_v63 }
 0x3ef   : > { %v2062_v50 = vpop.permute.xlu0 %2061  ;;  %1911 = vmatprep.mubr.msk.f32.mxu1 %vm748_vm7, %v1791_v47  ;;  %v2067_v3 = vpop.permute.xlu1 %2066 }
 0x3f0   : > { %v2064_v53 = vunpack.i.h.bf16 %v2062_v50  ;;  %v2063_v54 = vunpack.i.l.bf16 %v2062_v50  ;;  %1884 = vmatmul.mubr.msk.f32.vlgmr.msra.gmra.mrb[4].mxu0 %vm748_vm7, %v1778_v48  ;;  %v2069_v5 = vunpack.i.h.bf16 %v2067_v3  ;;  %v2068_v6 = vunpack.i.l.bf16 %v2067_v3 }
 0x3f1   : > { %1963 = vmatpush3.bf16.msra.mxu0 %v1960_v25  ;;  %1890 = vmatprep.mubr.msk.f32.mxu0 %vm748_vm7, %v852_v49 }
 0x3f2   : > { %v1964_v56 = vpack.c.bf16 %v2064_v53, %v2063_v54  ;;  %v1988_v9 = vpack.c.bf16 %v2069_v5, %v2068_v6 }
 0x3f4   : > { %1965 = vmatprep.subr.bf16.mxu0 %v1964_v56  ;;  %1912 = vmatmul.mubr.msk.f32.vlgmr.msra.gmra.mrb[0].mxu1 %vm748_vm7, %v1792_v55 }
 0x3f5   : > { %1979 = vmatpush3.bf16.msra.mxu1 %v1976_v46  ;;  %1918 = vmatprep.mubr.msk.f32.mxu1 %vm748_vm7, %v1795_v57 }
 0x3f6   : > { %1981 = vmatprep.subr.bf16.mxu1 %v1980_v58 }
 0x3f8   : > { %1891 = vmatmul.mubr.msk.f32.vlgmr.msra.gmra.mrb[4].mxu0 %vm748_vm7, %v853_v60 }
 0x3f9   : > { %1967 = vmatpush3.bf16.msra.mxu0 %v1964_v56  ;;  %1897 = vmatprep.mubr.msk.f32.mxu0 %vm748_vm7, %v1783_v61 }
 0x3fc   : > { %1919 = vmatmul.mubr.msk.f32.vlgmr.msra.gmra.mrb[0].mxu1 %vm748_vm7, %v1796_v0 }
 0x3fd   : > { %1983 = vmatpush3.bf16.msra.mxu1 %v1980_v58  ;;  %1925 = vmatprep.mubr.msk.f32.mxu1 %vm748_vm7, %v1799_v1 }
 0x3fe   : > { %1985 = vmatprep.subr.bf16.mxu1 %v1984_v2 }
 0x400   : > { %1898 = vmatmul.mubr.msk.f32.vlgmr.msra.gmra.mrb[4].mxu0 %vm748_vm7, %v1784_v4  ;;  %v1683_v18 = vpop.permute.xlu1 %1682  ;;  %v1678_v20 = vpop.permute.xlu0 %1677 }
 0x404   : > { %1926 = vmatmul.mubr.msk.f32.vlgmr.msra.gmra.mrb[0].mxu1 %vm748_vm7, %v1800_v7 }
 0x405   : > { %1987 = vmatpush3.bf16.msra.mxu1 %v1984_v2  ;;  %1932 = vmatprep.mubr.msk.f32.mxu1 %vm748_vm7, %v1803_v8 }
 0x406   : > { %1989 = vmatprep.subr.bf16.mxu1 %v1988_v9 }
 0x40c   : > { %1933 = vmatmul.mubr.msk.f32.vlgmr.msra.gmra.mrb[0].mxu1 %vm748_vm7, %v1804_v10 }
 0x40d   : > { %1991 = vmatpush3.bf16.msra.mxu1 %v1988_v9  ;;  %1939 = vmatprep.mubr.msk.f32.mxu1 %vm748_vm7, %v1807_v11 }
 0x414   : > { %1940 = vmatmul.mubr.msk.f32.vlgmr.msra.gmra.mrb[0].mxu1 %vm748_vm7, %v1808_v12 }
 0x4d3   : > { %v1899_v13 = vpop.f32.mrb[4].mxu0 }
 0x4d4   : > { %v1110_v14 = vpop.f32.mrb[5].mxu0 }
 0x4e7   : > { %v1941_v15 = vpop.f32.mrb[0].mxu1 }
 0x4e8   : > { %v1992_v16 = vadd.f32 %v1941_v15, %v1899_v13  ;;  %v1662_v17 = vpop.f32.mrb[1].mxu1 }
 0x4e9   : > { %v1993_v19 = vadd.f32 %v1662_v17, %v1110_v14 }
 0x4ea   : > { %v1686_v21 = vadd.f32 %v1992_v16, %v1683_v18 }
 0x4eb   : > { %v1685_v22 = vadd.f32 %v1993_v19, %v1678_v20 }
 0x4ec   : > { %1690 = vst.msk [vmem:[%s359_s29 + $0x8] sm:$0xf] %vm1689_vm8, %v1686_v21 }
 0x4ed   : > { %1688 = vst.msk [vmem:[%s359_s29] sm:$0xff] %vm1687_vm9, %v1685_v22 }
 0x4ee PF: > { %s20_s13 = sadd.s32 1, %s2076_s13  }
 0x4ef   : > { %p17_p4 = scmp.ge.s32.totalorder %s20_s13, 4  }
 0x4f1   :  { %19 = sbr.rel (!%p17_p4) target bundleno = 1 (0x1), region = 106 }

</bundles_post_ra>
